<compile_context>
chip_gen: v7x
topology: tpu7x:2x2x1
jax: 0.10.0
libtpu: 0.0.40
codegen_flags: <defaults>
</compile_context>

<pallas_src>
import functools

import jax
import jax.numpy as jnp
import numpy as np
from jax.experimental import pallas as pl
from jax.experimental.pallas import tpu as pltpu

_LANE = 128


def _argmax_axis0(x):
    """First-occurrence argmax along axis 0. x: (C, N) -> (1, N) int32."""
    c = x.shape[0]
    mx = jnp.max(x, axis=0, keepdims=True)                    # (1, N)
    idx = jax.lax.broadcasted_iota(jnp.int32, x.shape, 0)     # (C, N)
    return jnp.min(jnp.where(x == mx, idx, c), axis=0, keepdims=True)


def _iou_counts_kernel(pred_ref, targ_ref, out_ref,
                       tp_acc, p_acc, t_acc, *,
                       n_class, n_pixels, tn, acc_w,
                       tiles_per_split, mask_tail):
    """Grid step (b, p, n): argmax over channels on a (C, TN) pixel slab and
    accumulate per-class TP / pred-count / target-count partial sums into
    narrow (n_class, acc_w) accumulators held in vregs within the step.

    pred_ref/targ_ref: (1, C, TN) VMEM tiles.
    out_ref:           (1, 3, n_class, acc_w) lane-dense partial counts.
    tp_acc/p_acc/t_acc:(n_class, acc_w) f32 VMEM (persist over the n axis).
    """
    nb = pl.program_id(2)

    @pl.when(nb == 0)
    def _init():
        tp_acc[...] = jnp.zeros_like(tp_acc)
        p_acc[...] = jnp.zeros_like(p_acc)
        t_acc[...] = jnp.zeros_like(t_acc)

    pred = pred_ref[0]                  # (C, TN)
    targ = targ_ref[0]                  # (C, TN)

    p_arg = _argmax_axis0(pred)         # (1, TN) int32
    t_arg = _argmax_axis0(targ)         # (1, TN) int32

    # Mask ragged tail / over-coverage at (1, TN) width with a sentinel class
    # id (n_class never matches any class row -> drops out of all 3 counts).
    if mask_tail:
        lane = jax.lax.broadcasted_iota(jnp.int32, (1, tn), 1)
        g_tile = pl.program_id(1) * tiles_per_split + nb
        valid = (g_tile * tn + lane) < n_pixels        # (1, TN)
        p_arg = jnp.where(valid, p_arg, n_class)
        t_arg = jnp.where(valid, t_arg, n_class)

    class_ids = jax.lax.broadcasted_iota(jnp.int32, (n_class, 1), 0)

    # Running sums stay in vregs across the unrolled chunk loop; the narrow
    # scratch is touched only once per grid step.
    acc_tp = tp_acc[...]
    acc_p = p_acc[...]
    acc_t = t_acc[...]
    for k in range(tn // acc_w):
        pa = p_arg[:, k * acc_w:(k + 1) * acc_w]       # (1, acc_w)
        ta = t_arg[:, k * acc_w:(k + 1) * acc_w]
        pm = (pa == class_ids).astype(jnp.float32)     # (n_class, acc_w)
        tm = (ta == class_ids).astype(jnp.float32)
        acc_tp = acc_tp + pm * tm                      # TP
        acc_p = acc_p + pm                             # pred histogram
        acc_t = acc_t + tm                             # target histogram
    tp_acc[...] = acc_tp
    p_acc[...] = acc_p
    t_acc[...] = acc_t

    @pl.when(nb == pl.num_programs(2) - 1)
    def _finalize():
        out_ref[0, 0] = acc_tp
        out_ref[0, 1] = acc_p
        out_ref[0, 2] = acc_t


def argmax_iou(prediction, target, n_class):
    """JAX/Pallas equivalent of ArgmaxIOU.forward.

    prediction, target: (B, C, H, W) float32 (NCHW, like PyTorch).
    Returns scalar float32: mean over batch of per-class mean IoU; classes
    with TP == 0 are excluded, NaN if no class qualifies (as in reference).
    """
    B, C, H, W = prediction.shape
    N = H * W
    pred = prediction.reshape(B, C, N).astype(jnp.float32)
    targ = target.reshape(B, C, N).astype(jnp.float32)

    c_pad = ((C + 7) // 8) * 8                       # sublane-padded channels
    ncls_pad = ((n_class + 7) // 8) * 8
    n_pad = ((N + _LANE - 1) // _LANE) * _LANE       # lane-rounded pixel count

    # ---- generation-aware tile / VMEM sizing --------------------------------
    try:
        info = pltpu.get_tpu_info()
        vmem_cap = int(getattr(info, "vmem_capacity_bytes", 0) or 0)
    except Exception:
        vmem_cap = 0
    if vmem_cap and vmem_cap <= 80 * 1024 * 1024:
        # v7x-class: 3.2 TB/s HBM but only 64 MiB VMEM/TC -> bigger tiles to
        # hide the ~0.35 us/step overhead, tighter absolute VMEM cap.
        target_block_bytes = 4 * 1024 * 1024
        vmem_cap_limit = 40 * 1024 * 1024
    else:
        # v5e/v6e: HBM-bound already at ~1 MiB per input block; 128 MiB VMEM.
        target_block_bytes = 1 * 1024 * 1024
        vmem_cap_limit = 48 * 1024 * 1024

    tn = (target_block_bytes // 4 // c_pad) // _LANE * _LANE
    tn = max(_LANE, min(tn, n_pad))

    # Accumulator lane width: a divisor of TN, multiple of 128; narrower for
    # large n_class to bound live vregs across the unrolled chunk loop.
    acc_pref = 512 if n_class <= 8 else (256 if n_class <= 16 else 128)
    acc_w = min(acc_pref, tn)
    while tn % acc_w != 0:
        acc_w -= _LANE

    total_tiles = pl.cdiv(N, tn)
    # Extra "parallel" pixel-split axis so both TensorCores (v7x) stay busy
    # when B alone can't feed them (B == 1 or odd). Harmless on 1-core chips.
    n_split = 2 if (B % 2 == 1 and total_tiles >= 2) else 1
    tiles_per_split = pl.cdiv(total_tiles, n_split)
    need_clamp = (n_split * tiles_per_split != total_tiles)
    mask_tail = (n_split * tiles_per_split * tn != N)

    def in_index_map(b, p, n):
        tile = p * tiles_per_split + n
        if need_clamp:  # keep the DMA in-bounds; sentinel mask drops the dup
            tile = jnp.minimum(tile, total_tiles - 1)
        return (b, 0, tile)

    def out_index_map(b, p, n):
        return (b * n_split + p, 0, 0, 0)

    # VMEM budget estimate including sublane padding.
    block_bytes = c_pad * tn * 4
    acc_bytes = 3 * ncls_pad * acc_w * 4
    out_block_bytes = 3 * ncls_pad * acc_w * 4
    vmem_est = 2 * 2 * block_bytes + acc_bytes + 2 * out_block_bytes
    vmem_limit = int(min(vmem_cap_limit, max(2 * vmem_est, 8 * 1024 * 1024)))

    kernel = functools.partial(
        _iou_counts_kernel, n_class=n_class, n_pixels=N, tn=tn, acc_w=acc_w,
        tiles_per_split=tiles_per_split, mask_tail=mask_tail)

    folded = pl.pallas_call(
        kernel,
        out_shape=jax.ShapeDtypeStruct((B * n_split, 3, n_class, acc_w),
                                       jnp.float32),
        grid_spec=pltpu.PrefetchScalarGridSpec(
            num_scalar_prefetch=0,
            grid=(B, n_split, tiles_per_split),
            in_specs=[pl.BlockSpec((1, C, tn), in_index_map),
                      pl.BlockSpec((1, C, tn), in_index_map)],
            out_specs=pl.BlockSpec((1, 3, n_class, acc_w), out_index_map),
            scratch_shapes=[pltpu.VMEM((n_class, acc_w), jnp.float32)] * 3,
        ),
        compiler_params=pltpu.CompilerParams(
            dimension_semantics=("parallel", "parallel", "arbitrary"),
            vmem_limit_bytes=vmem_limit),
        cost_estimate=pl.CostEstimate(
            flops=int(B * N * (6 * C + 8 * n_class)),
            transcendentals=0,
            bytes_accessed=int(2 * B * C * N * 4
                               + B * n_split * 3 * n_class * acc_w * 4)),
    )(pred, targ)                            # (B*P, 3, n_class, acc_w)

    counts = folded.reshape(B, n_split, 3, n_class, acc_w).sum(axis=(1, 4))
    tp = counts[:, 0, :]                     # (B, n_class)
    p_cnt = counts[:, 1, :]
    t_cnt = counts[:, 2, :]
    fp = p_cnt - tp
    fn = t_cnt - tp
    d = tp + fp + fn

    valid = tp > 0.0                 # TP != 0 (implies denominator != 0)
    iou = jnp.where(valid, tp / jnp.where(valid, d, 1.0), 0.0)
    n_valid = jnp.sum(valid.astype(jnp.float32), axis=1)
    # torch.mean(FloatTensor([])) == NaN, reproduced by 0/0 here.
    per_batch = jnp.sum(iou, axis=1) / n_valid
    return jnp.mean(per_batch)


def argmax_iou_ref(prediction, target, n_class):
    """Pure-numpy reference mirroring the PyTorch module exactly."""
    pred = np.asarray(prediction)
    targ = np.asarray(target)
    scores = []
    for b in range(pred.shape[0]):
        yp = np.argmax(pred[b], axis=0)
        yt = np.argmax(targ[b], axis=0)
        ious = []
        for c in range(n_class):
            TP = int(np.sum((yt == c) & (yp == c)))
            FP = int(np.sum((yt != c) & (yp == c)))
            FN = int(np.sum((yt == c) & (yp != c)))
            d = TP + FP + FN
            if TP != 0 and d != 0:
                ious.append(TP / d)
        scores.append(np.mean(ious) if ious else np.nan)
    return np.float32(np.mean(np.asarray(scores, dtype=np.float32)))


if __name__ == "__main__":
    B, C, H, W = 2, 4, 16, 16
    n_class = C

    key = jax.random.PRNGKey(0)
    k1, k2 = jax.random.split(key)
    prediction = jax.random.normal(k1, (B, C, H, W), dtype=jnp.float32)
    target = jax.random.normal(k2, (B, C, H, W), dtype=jnp.float32)

    out = argmax_iou(prediction, target, n_class)
    out = jax.block_until_ready(out)

    ref = argmax_iou_ref(prediction, target, n_class)
    assert np.allclose(np.asarray(out), ref, rtol=1e-5, atol=1e-6), (out, ref)
    print("KERNEL_OK")
</pallas_src>

<mosaic_0001>
module attributes {stable_mosaic.version = 11 : i64} {
  func.func @_iou_counts_kernel(%arg0: i32, %arg1: i32, %arg2: i32, %arg3: memref<1x4x256xf32, #tpu.memory_space<vmem>>, %arg4: memref<1x4x256xf32, #tpu.memory_space<vmem>>, %arg5: memref<1x3x4x256xf32, #tpu.memory_space<vmem>>, %arg6: memref<4x256xf32, #tpu.memory_space<vmem>>, %arg7: memref<4x256xf32, #tpu.memory_space<vmem>>, %arg8: memref<4x256xf32, #tpu.memory_space<vmem>>) attributes {dimension_semantics = [#tpu.dimension_semantics<parallel>, #tpu.dimension_semantics<parallel>, #tpu.dimension_semantics<arbitrary>], iteration_bounds = array<i64: 2, 1, 1>, scalar_prefetch = 0 : i64, scratch_operands = 3 : i64, tpu.core_type = #tpu.core_type<tc>, window_params = [{transform_indices = @transform_0, window_bounds = array<i64: 1, 4, 256>}, {transform_indices = @transform_1, window_bounds = array<i64: 1, 4, 256>}, {transform_indices = @transform_2, window_bounds = array<i64: 1, 3, 4, 256>}]} {
    %c0_i32 = arith.constant 0 : i32
    %0 = arith.cmpi eq, %arg2, %c0_i32 : i32
    %1 = arith.extui %0 : i1 to i32
    %c0_i32_0 = arith.constant 0 : i32
    %2 = arith.cmpi ne, %1, %c0_i32_0 : i32
    scf.if %2 {
      %cst_24 = arith.constant 0.000000e+00 : f32
      %49 = vector.broadcast %cst_24 : f32 to vector<4x256xf32>
      %c0_25 = arith.constant 0 : index
      %c0_26 = arith.constant 0 : index
      %50 = vector.load %arg6[%c0_25, %c0_26] : memref<4x256xf32, #tpu.memory_space<vmem>>, vector<4x256xf32>
      tpu.vector_store %arg6[%c0_25, %c0_26], %49 {strides = array<i32>} : memref<4x256xf32, #tpu.memory_space<vmem>>, vector<4x256xf32>,
      %cst_27 = arith.constant 0.000000e+00 : f32
      %51 = vector.broadcast %cst_27 : f32 to vector<4x256xf32>
      %c0_28 = arith.constant 0 : index
      %c0_29 = arith.constant 0 : index
      %52 = vector.load %arg7[%c0_28, %c0_29] : memref<4x256xf32, #tpu.memory_space<vmem>>, vector<4x256xf32>
      tpu.vector_store %arg7[%c0_28, %c0_29], %51 {strides = array<i32>} : memref<4x256xf32, #tpu.memory_space<vmem>>, vector<4x256xf32>,
      %cst_30 = arith.constant 0.000000e+00 : f32
      %53 = vector.broadcast %cst_30 : f32 to vector<4x256xf32>
      %c0_31 = arith.constant 0 : index
      %c0_32 = arith.constant 0 : index
      %54 = vector.load %arg8[%c0_31, %c0_32] : memref<4x256xf32, #tpu.memory_space<vmem>>, vector<4x256xf32>
      tpu.vector_store %arg8[%c0_31, %c0_32], %53 {strides = array<i32>} : memref<4x256xf32, #tpu.memory_space<vmem>>, vector<4x256xf32>,
    } else {
    }
    %c0 = arith.constant 0 : index
    %c0_1 = arith.constant 0 : index
    %c0_2 = arith.constant 0 : index
    %3 = vector.load %arg3[%c0, %c0_1, %c0_2] : memref<1x4x256xf32, #tpu.memory_space<vmem>>, vector<1x4x256xf32>
    %4 = vector.shape_cast %3 : vector<1x4x256xf32> to vector<4x256xf32>
    %c0_3 = arith.constant 0 : index
    %c0_4 = arith.constant 0 : index
    %c0_5 = arith.constant 0 : index
    %5 = vector.load %arg4[%c0_3, %c0_4, %c0_5] : memref<1x4x256xf32, #tpu.memory_space<vmem>>, vector<1x4x256xf32>
    %6 = vector.shape_cast %5 : vector<1x4x256xf32> to vector<4x256xf32>
    %cst = arith.constant dense<0xFF800000> : vector<256xf32>
    %7 = vector.multi_reduction <maximumf>, %4, %cst [0] : vector<4x256xf32> to vector<256xf32>
    %8 = vector.shape_cast %7 : vector<256xf32> to vector<1x256xf32>
    %9 = tpu.iota {dimensions = array<i32: 0>} : vector<4x256xi32>
    %10 = vector.broadcast %8 : vector<1x256xf32> to vector<4x256xf32>
    %11 = arith.cmpf oeq, %4, %10 : vector<4x256xf32>
    %c4_i32 = arith.constant 4 : i32
    %12 = vector.broadcast %c4_i32 : i32 to vector<4x256xi32>
    %13 = arith.select %11, %9, %12 : vector<4x256xi1>, vector<4x256xi32>
    %cst_6 = arith.constant dense<2147483647> : vector<256xi32>
    %14 = vector.multi_reduction <minsi>, %13, %cst_6 [0] : vector<4x256xi32> to vector<256xi32>
    %15 = vector.shape_cast %14 : vector<256xi32> to vector<1x256xi32>
    %cst_7 = arith.constant dense<0xFF800000> : vector<256xf32>
    %16 = vector.multi_reduction <maximumf>, %6, %cst_7 [0] : vector<4x256xf32> to vector<256xf32>
    %17 = vector.shape_cast %16 : vector<256xf32> to vector<1x256xf32>
    %18 = tpu.iota {dimensions = array<i32: 0>} : vector<4x256xi32>
    %19 = vector.broadcast %17 : vector<1x256xf32> to vector<4x256xf32>
    %20 = arith.cmpf oeq, %6, %19 : vector<4x256xf32>
    %c4_i32_8 = arith.constant 4 : i32
    %21 = vector.broadcast %c4_i32_8 : i32 to vector<4x256xi32>
    %22 = arith.select %20, %18, %21 : vector<4x256xi1>, vector<4x256xi32>
    %cst_9 = arith.constant dense<2147483647> : vector<256xi32>
    %23 = vector.multi_reduction <minsi>, %22, %cst_9 [0] : vector<4x256xi32> to vector<256xi32>
    %24 = vector.shape_cast %23 : vector<256xi32> to vector<1x256xi32>
    %25 = tpu.iota {dimensions = array<i32: 0>} : vector<4x1xi32>
    %c0_10 = arith.constant 0 : index
    %c0_11 = arith.constant 0 : index
    %26 = vector.load %arg6[%c0_10, %c0_11] : memref<4x256xf32, #tpu.memory_space<vmem>>, vector<4x256xf32>
    %c0_12 = arith.constant 0 : index
    %c0_13 = arith.constant 0 : index
    %27 = vector.load %arg7[%c0_12, %c0_13] : memref<4x256xf32, #tpu.memory_space<vmem>>, vector<4x256xf32>
    %c0_14 = arith.constant 0 : index
    %c0_15 = arith.constant 0 : index
    %28 = vector.load %arg8[%c0_14, %c0_15] : memref<4x256xf32, #tpu.memory_space<vmem>>, vector<4x256xf32>
    %29 = vector.broadcast %15 : vector<1x256xi32> to vector<4x256xi32>
    %30 = vector.broadcast %25 : vector<4x1xi32> to vector<4x256xi32>
    %31 = arith.cmpi eq, %29, %30 : vector<4x256xi32>
    %32 = arith.extui %31 : vector<4x256xi1> to vector<4x256xi32>
    %33 = arith.sitofp %32 : vector<4x256xi32> to vector<4x256xf32>
    %34 = vector.broadcast %24 : vector<1x256xi32> to vector<4x256xi32>
    %35 = vector.broadcast %25 : vector<4x1xi32> to vector<4x256xi32>
    %36 = arith.cmpi eq, %34, %35 : vector<4x256xi32>
    %37 = arith.extui %36 : vector<4x256xi1> to vector<4x256xi32>
    %38 = arith.sitofp %37 : vector<4x256xi32> to vector<4x256xf32>
    %39 = arith.mulf %33, %38 : vector<4x256xf32>
    %40 = arith.addf %26, %39 : vector<4x256xf32>
    %41 = arith.addf %27, %33 : vector<4x256xf32>
    %42 = arith.addf %28, %38 : vector<4x256xf32>
    %c0_16 = arith.constant 0 : index
    %c0_17 = arith.constant 0 : index
    %43 = vector.load %arg6[%c0_16, %c0_17] : memref<4x256xf32, #tpu.memory_space<vmem>>, vector<4x256xf32>
    tpu.vector_store %arg6[%c0_16, %c0_17], %40 {strides = array<i32>} : memref<4x256xf32, #tpu.memory_space<vmem>>, vector<4x256xf32>,
    %c0_18 = arith.constant 0 : index
    %c0_19 = arith.constant 0 : index
    %44 = vector.load %arg7[%c0_18, %c0_19] : memref<4x256xf32, #tpu.memory_space<vmem>>, vector<4x256xf32>
    tpu.vector_store %arg7[%c0_18, %c0_19], %41 {strides = array<i32>} : memref<4x256xf32, #tpu.memory_space<vmem>>, vector<4x256xf32>,
    %c0_20 = arith.constant 0 : index
    %c0_21 = arith.constant 0 : index
    %45 = vector.load %arg8[%c0_20, %c0_21] : memref<4x256xf32, #tpu.memory_space<vmem>>, vector<4x256xf32>
    tpu.vector_store %arg8[%c0_20, %c0_21], %42 {strides = array<i32>} : memref<4x256xf32, #tpu.memory_space<vmem>>, vector<4x256xf32>,
    %c0_i32_22 = arith.constant 0 : i32
    %46 = arith.cmpi eq, %arg2, %c0_i32_22 : i32
    %47 = arith.extui %46 : i1 to i32
    %c0_i32_23 = arith.constant 0 : i32
    %48 = arith.cmpi ne, %47, %c0_i32_23 : i32
    scf.if %48 {
      %c0_24 = arith.constant 0 : index
      %c0_25 = arith.constant 0 : index
      %c0_26 = arith.constant 0 : index
      %c0_27 = arith.constant 0 : index
      %49 = vector.load %arg5[%c0_24, %c0_25, %c0_26, %c0_27] : memref<1x3x4x256xf32, #tpu.memory_space<vmem>>, vector<1x1x4x256xf32>
      %50 = vector.shape_cast %49 : vector<1x1x4x256xf32> to vector<4x256xf32>
      %51 = vector.shape_cast %40 : vector<4x256xf32> to vector<1x1x4x256xf32>
      tpu.vector_store %arg5[%c0_24, %c0_25, %c0_26, %c0_27], %51 {strides = array<i32>} : memref<1x3x4x256xf32, #tpu.memory_space<vmem>>, vector<1x1x4x256xf32>,
      %c0_28 = arith.constant 0 : index
      %c1 = arith.constant 1 : index
      %c0_29 = arith.constant 0 : index
      %c0_30 = arith.constant 0 : index
      %52 = vector.load %arg5[%c0_28, %c1, %c0_29, %c0_30] : memref<1x3x4x256xf32, #tpu.memory_space<vmem>>, vector<1x1x4x256xf32>
      %53 = vector.shape_cast %52 : vector<1x1x4x256xf32> to vector<4x256xf32>
      %54 = vector.shape_cast %41 : vector<4x256xf32> to vector<1x1x4x256xf32>
      tpu.vector_store %arg5[%c0_28, %c1, %c0_29, %c0_30], %54 {strides = array<i32>} : memref<1x3x4x256xf32, #tpu.memory_space<vmem>>, vector<1x1x4x256xf32>,
      %c0_31 = arith.constant 0 : index
      %c2 = arith.constant 2 : index
      %c0_32 = arith.constant 0 : index
      %c0_33 = arith.constant 0 : index
      %55 = vector.load %arg5[%c0_31, %c2, %c0_32, %c0_33] : memref<1x3x4x256xf32, #tpu.memory_space<vmem>>, vector<1x1x4x256xf32>
      %56 = vector.shape_cast %55 : vector<1x1x4x256xf32> to vector<4x256xf32>
      %57 = vector.shape_cast %42 : vector<4x256xf32> to vector<1x1x4x256xf32>
      tpu.vector_store %arg5[%c0_31, %c2, %c0_32, %c0_33], %57 {strides = array<i32>} : memref<1x3x4x256xf32, #tpu.memory_space<vmem>>, vector<1x1x4x256xf32>,
    } else {
    }
    return
  }
  func.func @transform_0(%arg0: i32, %arg1: i32, %arg2: i32) -> (i32, i32, i32) {
    %c1_i32 = arith.constant 1 : i32
    %0 = arith.muli %arg1, %c1_i32 : i32
    %1 = arith.addi %0, %arg2 : i32
    %c0_i32 = arith.constant 0 : i32
    %c0_i32_0 = arith.constant 0 : i32
    return %arg0, %c0_i32, %1 : i32, i32, i32
  }
  func.func @transform_1(%arg0: i32, %arg1: i32, %arg2: i32) -> (i32, i32, i32) {
    %c1_i32 = arith.constant 1 : i32
    %0 = arith.muli %arg1, %c1_i32 : i32
    %1 = arith.addi %0, %arg2 : i32
    %c0_i32 = arith.constant 0 : i32
    %c0_i32_0 = arith.constant 0 : i32
    return %arg0, %c0_i32, %1 : i32, i32, i32
  }
  func.func @transform_2(%arg0: i32, %arg1: i32, %arg2: i32) -> (i32, i32, i32, i32) {
    %c1_i32 = arith.constant 1 : i32
    %0 = arith.muli %arg0, %c1_i32 : i32
    %1 = arith.addi %0, %arg1 : i32
    %c0_i32 = arith.constant 0 : i32
    %c0_i32_0 = arith.constant 0 : i32
    %c0_i32_1 = arith.constant 0 : i32
    %c0_i32_2 = arith.constant 0 : i32
    return %1, %c0_i32, %c0_i32_0, %c0_i32_1 : i32, i32, i32, i32
  }
}

</mosaic_0001>

<bundles_post_ra>
// kernel: tpu_custom_call.1
= control target key start
LH: loop header
LB: loop body
LE: loop exit
PB: predicated region body
PF: predicated region fallthrough
CT: control target
= control target key end

     0   :  { %7 = vsyncpa [#allocation6], 0  ;;  %s1027_s0 = inlined_call_operand.hbm [shape: f32[2,4,256], index: 0, kind: input, shape index: {}]   ;;  %s1028_s1 = inlined_call_operand.hbm [shape: f32[2,4,256], index: 1, kind: input, shape index: {}]   ;;  %s1029_s2 = inlined_call_operand.hbm [shape: f32[2,3,4,256], index: 2, kind: output, shape index: {}]  }
   0x1   :  { %9 = vsyncpa [#allocation6 + $0x1], 0 }
   0x2   :  { %10 = vsyncpa [#allocation9], 0 }
   0x3   :  { %12 = vsyncpa [#allocation9 + $0x1], 0 }
   0x4   :  { %13 = vsyncpa [#allocation7], 0 }
   0x5   :  { %15 = vsyncpa [#allocation7 + $0x1], 0  ;;  %s788_s9 = smov 0   ;;  %s790_s10 = smov 0  }
   0x6   :  { %s792_s11 = smov 0   ;;  %s794_s12 = smov 0  }
   0x7   :  { %s796_s13 = smov 0   ;;  %s798_s14 = smov 0  }
   0x8 LB: > { %s519_s15 = sadd.s32 4294967295, %s764_s14   ;;  %s520_s16 = sadd.s32 4294967294, %s764_s14   ;;  %s764_s14 = sphi %s798_s14, %s21_s14   ;;  %s760_s13 = sphi %s796_s13, %s1049_s13   ;;  %s756_s12 = sphi %s794_s12, %s1048_s12   ;;  %s752_s11 = sphi %s792_s11, %s1047_s11   ;;  %s748_s10 = sphi %s790_s10, %s1046_s10   ;;  %s744_s9 = sphi %s788_s9, %s1045_s9  }
   0x9   : > { %s40_s17 = sadd.s32 1, %s760_s13  ;;  %s51_s18 = sadd.s32 1, %s752_s11 }
   0xa   : > { %p42_p0 = scmp.ge.s32.totalorder %s40_s17, 2  ;;  %p58_p1 = scmp.ne.s32.totalorder %s752_s11, %s748_s10 }
   0xb   : > { %p59_p2 = scmp.eq.s32.totalorder %s764_s14, 0  ;;  %p64_p3 = scmp.ne.s32.totalorder %s748_s10, %s744_s9 }
   0xc   : > { %s1051_s17 = smov (%p42_p0, %s40_s17), 0  ;;  %p65_p5 = scmp.eq.s32.totalorder %s519_s15, 0 }
   0xd   : > { %p829_p4 = por %p59_p2, %p58_p1  ;;  %s46_s20 = ssub.s32 %s760_s13, %s1051_s17 }
   0xe   : > { %p120_p6 = scmp.eq.s32.totalorder %s519_s15, 1  ;;  %p49_p7 = scmp.eq.s32.totalorder %s46_s20, 0 }
   0xf   : > { %p835_p8 = por %p65_p5, %p64_p3  ;;  %p126_p10 = scmp.eq.s32.totalorder %s520_s16, 1 }
  0x10   : > { %p839_p9 = por %p120_p6, %p58_p1  ;;  %p562_p13 = scmp.lt.s32.totalorder %s764_s14, 2 }
  0x11   : > { %s1033_s21 = scalar_select %p835_p8, 1, 0 }
  0x12   : > { %s1034_s22 = scalar_select %p839_p9, 1, 0 }
  0x13   : > { %s844_s23 = scalar_select %p49_p7, %s752_s11, %s51_s18  }
  0x14   : > { %p846_p11 = por %p126_p10, %p64_p3  ;;  %s853_s25 = sand.u32 1, %s752_s11  }
  0x15   : > { %s523_s26 = sshll.u32 %s853_s25, 3  ;;  %s541_s27 = sshll.u32 %s760_s13, 7 }
  0x16   : > { %s1035_s24 = scalar_select %p846_p11, 1, 0 }
  0x17   : > { %s862_s30 = scalar_lea.hbm %s1027_s0, %s541_s27  ;;  %s150_s3 = scalar_lea.vmem [#allocation5], %s523_s26 }
  0x18   : > { %s161_s4 = sshll.u32 %s150_s3, 4  ;;  %p870_p0 = pnand %p562_p13, %p829_p4  ;;  %s866_s4 = int_to_ptr.vmem [resolvable:$true] %s161_s4 }
  0x19   : > { %s147_s6 = scalar_lea.sflag [#allocation6], %s853_s25  ;;  %s618_s7 = scalar_lea.hbm %s862_s30, 128 }
  0x1a   : > { %p619_p3 = scmp.ne.s32.totalorder %s862_s30, %s618_s7  ;;  %p620_p5 = pneg %p870_p0 }
  0x1b   : > { %s623_s16 = scalar_lea.hbm %s1027_s0, 256  ;;  %p624_p4 = scmp.lt.u32.totalorder %s862_s30, %s1027_s0 }
  0x1c   : > { %p621_p6 = pnand %p620_p5, %p619_p3  ;;  %p625_p10 = scmp.lt.u32.totalorder %s623_s16, %s618_s7 }
  0x1d   : > { %p627_p12 = scmp.lt.u32.totalorder %s618_s7, %s862_s30 }
  0x1e   : > { %p622_p7 = pneg %p621_p6  ;;  %p626_p13 = por %p625_p10, %p624_p4 }
  0x20   : > { %p628_p1 = por %p627_p12, %p626_p13 }
  0x22   : > { %p629_p2 = pnand %p628_p1, %p622_p7 }
  0x24   : > { %632 = shalt.err (!%p629_p2)
}
  0x25   : > { %s633_s20 = scalar_lea.vmem %s866_s4, 128  ;;  %s766_s28 = smov [#allocation5]  }
  0x26   : > { %p634_p3 = scmp.ne.s32.totalorder %s866_s4, %s633_s20  ;;  %s638_s29 = sshll.u32 %s766_s28, 4  ;;  %s639_s29 = int_to_ptr.vmem [resolvable:$false] %s638_s29 }
  0x27   : > { %s640_s3 = scalar_lea.vmem %s639_s29, 256  ;;  %p641_p9 = scmp.lt.s32.totalorder %s866_s4, %s639_s29 }
  0x28   : > { %p636_p6 = pnand %p634_p3, %p620_p5  ;;  %p642_p4 = scmp.lt.s32.totalorder %s640_s3, %s633_s20 }
  0x2a   : > { %p637_p11 = pneg %p636_p6  ;;  %p643_p10 = por %p642_p4, %p641_p9 }
  0x2c   : > { %p644_p12 = pnand %p643_p10, %p637_p11 }
  0x2e   : > { %647 = shalt.err (!%p644_p12)
}
  0x2f   : > { %554 = dma.hbm_to_vmem [thread:$0]  (!%p870_p0), %s862_s30, 128, %s866_s4, %s147_s6  }
  0x30   : > { %p1037_p1 = scmp.lt.s32.totalorder %s764_s14, 3  ;;  %p1038_p2 = scmp.ge.s32.totalorder %s764_s14, 1 }
  0x31   : > { %s915_s16 = scalar_lea.hbm %s1028_s1, %s541_s27  ;;  %s172_s18 = scalar_lea.vmem [#allocation8], %s523_s26 }
  0x32   : > { %p906_p7 = pnand %p1038_p2, %p1037_p1  ;;  %s183_s19 = sshll.u32 %s172_s18, 4  ;;  %s184_s19 = int_to_ptr.vmem [resolvable:$true] %s183_s19 }
  0x33   : > { %s169_s30 = scalar_lea.sflag [#allocation9], %s853_s25  ;;  %s648_s4 = scalar_lea.hbm %s915_s16, 128 }
  0x34   : > { %s1039_s7 = scalar_select %p906_p7, 1, 0 }
  0x35   : > { %p649_p9 = scmp.ne.s32.totalorder %s915_s16, %s648_s4  ;;  %s653_s27 = scalar_lea.hbm %s1028_s1, 256 }
  0x36   : > { %p654_p3 = scmp.lt.u32.totalorder %s915_s16, %s1028_s1  ;;  %p655_p6 = scmp.lt.u32.totalorder %s653_s27, %s648_s4 }
  0x37   : > { %p651_p11 = pnand %p649_p9, %p620_p5  ;;  %p657_p10 = scmp.lt.u32.totalorder %s648_s4, %s915_s16 }
  0x38   : > { %p656_p4 = por %p655_p6, %p654_p3 }
  0x39   : > { %p652_p13 = pneg %p651_p11 }
  0x3a   : > { %p658_p12 = por %p657_p10, %p656_p4 }
  0x3c   : > { %p659_p1 = pnand %p658_p12, %p652_p13 }
  0x3e   : > { %662 = shalt.err (!%p659_p1)
}
  0x3f   : > { %s663_s25 = scalar_lea.vmem %s184_s19, 128  ;;  %s767_s26 = smov [#allocation8]  }
  0x40   : > { %p664_p2 = scmp.ne.s32.totalorder %s184_s19, %s663_s25  ;;  %s668_s3 = sshll.u32 %s767_s26, 4  ;;  %s669_s3 = int_to_ptr.vmem [resolvable:$false] %s668_s3 }
  0x41   : > { %s670_s8 = scalar_lea.vmem %s669_s3, 256  ;;  %p671_p8 = scmp.lt.s32.totalorder %s184_s19, %s669_s3 }
  0x42   : > { %p666_p9 = pnand %p664_p2, %p620_p5  ;;  %p672_p7 = scmp.lt.s32.totalorder %s670_s8, %s663_s25 }
  0x44   : > { %p667_p11 = pneg %p666_p9  ;;  %p673_p3 = por %p672_p7, %p671_p8 }
  0x46   : > { %p674_p6 = pnand %p673_p3, %p667_p11 }
  0x48   : > { %677 = shalt.err (!%p674_p6)
}
  0x49   : > { %557 = dma.hbm_to_vmem [thread:$0]  (!%p870_p0), %s915_s16, 128, %s184_s19, %s169_s30  }
  0x4a   : > { %p1040_p13 = scmp.ne.s32.totalorder %s1039_s7, 0 }
  0x4b   : > { %s942_s15 = sand.u32 (!%p1040_p13), 1, %s748_s10   ;;  %p1041_p5 = scmp.ne.s32.totalorder (!%p1040_p13), %s1033_s21, 0 }
  0x4c   : > { %192 = sbr.rel (%p1040_p13) target bundleno = 142 (0x8e), region = 28  ;;  %s530_s18 = sshll.u32 (!%p1040_p13), %s942_s15, 3 }
  0x4d   : > { %s195_s4 = scalar_lea.sflag (!%p1040_p13), [#allocation6], %s942_s15  ;;  %s198_s6 = scalar_lea.vmem (!%p1040_p13), [#allocation5], %s530_s18 }
  0x53   : > { %731 = dma.done.wait (%p1041_p5), %s195_s4, 128  }
  0x54   : > { %733 = vsyncadd (%p1041_p5), %s195_s4, 4294967168  ;;  %s204_s5 = scalar_lea.sflag [#allocation9], %s942_s15  ;;  %s207_s16 = scalar_lea.vmem [#allocation8], %s530_s18 }
  0x55   : > { %735 = dma.done.wait (%p1041_p5), %s204_s5, 128  }
  0x56   : > { %737 = vsyncadd (%p1041_p5), %s204_s5, 4294967168  ;;  %vm250_vm0 = vcmask 1043456   ;;  %v245_v0 = vld [vmem:[%s198_s6] sm:$0xff]  ;;  %v246_v1 = vld [vmem:[%s207_s16] sm:$0xff]  ;;  %v265_v9 = vlaneseq  ;;  %v768_v10 = vmov 839922192  }
  0x57   : > { %v248_v2 = vcombine.high %v245_v0, %v245_v0  ;;  %v251_v3 = vsel %vm250_vm0, %v245_v0, -inf  ;;  %v302_v4 = vcombine.high %v246_v1, %v246_v1  ;;  %v304_v5 = vsel %vm250_vm0, %v246_v1, -inf  ;;  %s543_s21 = smul.u32 24, %s942_s15  ;;  %p1042_p0 = scmp.ne.s32.totalorder %s1034_s22, 0 }
  0x58   : > { %v252_v6 = vrot.slane %v251_v3, 4  ;;  %v305_v7 = vrot.slane %v304_v5, 4  ;;  %v273_v11 = vunpack.c.l.s4 %v768_v10  ;;  %v959_v21 = vshrl.u32 %v265_v9, 7  ;;  %s544_s7 = smul.u32 384, %s756_s12  ;;  %s389_s12 = scalar_lea.sflag [#allocation7], %s942_s15 }
  0x59   : > { %v258_v8 = vsel %vm250_vm0, %v248_v2, -inf  ;;  %v311_v12 = vsel %vm250_vm0, %v302_v4, -inf  ;;  %v769_v9 = vmov 0.0   ;;  %s232_s19 = scalar_lea.vmem [#allocation10], %s543_s21  ;;  %s770_s25 = smov [#allocation10]  }
  0x5a   : > { %v253_v13 = vmax.f32 %v251_v3, %v252_v6  ;;  %v259_v14 = vrot.slane %v258_v8, 4  ;;  %v306_v15 = vmax.f32 %v304_v5, %v305_v7  ;;  %v312_v16 = vrot.slane %v311_v12, 4  ;;  %s403_s30 = sshll.u32 %s232_s19, 4  ;;  %s976_s28 = scalar_lea.hbm %s1029_s2, %s544_s7  ;;  %s978_s30 = int_to_ptr.vmem [resolvable:$true] %s403_s30 }
  0x5b   : > { %v274_v22 = vunpack.c.0.s8 %v273_v11  ;;  %s678_s29 = scalar_lea.vmem %s978_s30, 384  ;;  %s682_s26 = sshll.u32 %s770_s25, 4  ;;  %s683_s26 = int_to_ptr.vmem [resolvable:$false] %s682_s26 }
  0x5c   : > { %v254_v17 = vrot.slane %v253_v13, 2  ;;  %v260_v18 = vmax.f32 %v258_v8, %v259_v14  ;;  %v307_v19 = vrot.slane %v306_v15, 2  ;;  %v313_v20 = vmax.f32 %v311_v12, %v312_v16  ;;  %p679_p8 = scmp.ne.s32.totalorder %s978_s30, %s678_s29  ;;  %s684_s3 = scalar_lea.vmem %s683_s26, 768 }
  0x5d   : > { %v277_v31 = vsub.s32 %v274_v22, %v959_v21  ;;  %p685_p10 = scmp.lt.s32.totalorder %s978_s30, %s683_s26  ;;  %p686_p12 = scmp.lt.s32.totalorder %s684_s3, %s678_s29 }
  0x5e   : > { %v255_v23 = vmax.f32 %v253_v13, %v254_v17  ;;  %v261_v24 = vrot.slane %v260_v18, 2  ;;  %v308_v25 = vmax.f32 %v306_v15, %v307_v19  ;;  %v314_v26 = vrot.slane %v313_v20, 2  ;;  %p680_p7 = pnand %p679_p8, %p1042_p0 }
  0x5f   : > { %v278_v38 = vrot.slane %v959_v21, %v277_v31  ;;  %p687_p1 = por %p686_p12, %p685_p10 }
  0x60   : > { %v256_v27 = vrot.slane %v255_v23, 1  ;;  %v262_v28 = vmax.f32 %v260_v18, %v261_v24  ;;  %v309_v29 = vrot.slane %v308_v25, 1  ;;  %v315_v30 = vmax.f32 %v313_v20, %v314_v26  ;;  %p681_p4 = pneg %p680_p7 }
  0x62   : > { %v257_v32 = vmax.f32 %v255_v23, %v256_v27  ;;  %v263_v33 = vrot.slane %v262_v28, 1  ;;  %v310_v34 = vmax.f32 %v308_v25, %v309_v29  ;;  %v316_v35 = vrot.slane %v315_v30, 1  ;;  %p688_p2 = pnand %p687_p1, %p681_p4 }
  0x64   : > { %v264_v36 = vmax.f32 %v262_v28, %v263_v33  ;;  %v317_v37 = vmax.f32 %v315_v30, %v316_v35 }
  0x66   : > { %v269_v39 = vcombine.low %v257_v32, %v264_v36  ;;  %v320_v40 = vcombine.low %v310_v34, %v317_v37 }
  0x68   : > { %vm271_vm1 = vcmp.eq.f32.partialorder %v245_v0, %v269_v39  ;;  %vm322_vm2 = vcmp.eq.f32.partialorder %v246_v1, %v320_v40 }
  0x69   : > { %v279_v41 = vsel %vm271_vm1, %v278_v38, 4  ;;  %v323_v42 = vsel %vm322_vm2, %v278_v38, 4 }
  0x6a   : > { %v280_v43 = vcombine.high %v279_v41, %v279_v41  ;;  %v281_v44 = vsel %vm250_vm0, %v279_v41, 2147483647  ;;  %v324_v45 = vcombine.high %v323_v42, %v323_v42  ;;  %v325_v46 = vsel %vm250_vm0, %v323_v42, 2147483647 }
  0x6b   : > { %v282_v47 = vrot.slane %v281_v44, 4  ;;  %v326_v48 = vrot.slane %v325_v46, 4 }
  0x6c   : > { %v291_v49 = vsel %vm250_vm0, %v280_v43, 2147483647  ;;  %v335_v50 = vsel %vm250_vm0, %v324_v45, 2147483647 }
  0x6d   : > { %vm283_vm3 = vcmp.lt.s32.totalorder %v281_v44, %v282_v47  ;;  %v292_v51 = vrot.slane %v291_v49, 4  ;;  %vm327_vm4 = vcmp.lt.s32.totalorder %v325_v46, %v326_v48  ;;  %v336_v52 = vrot.slane %v335_v50, 4 }
  0x6e   : > { %v284_v53 = vsel %vm283_vm3, %v281_v44, %v282_v47  ;;  %v328_v54 = vsel %vm327_vm4, %v325_v46, %v326_v48 }
  0x6f   : > { %v285_v55 = vrot.slane %v284_v53, 2  ;;  %vm293_vm5 = vcmp.lt.s32.totalorder %v291_v49, %v292_v51  ;;  %v329_v56 = vrot.slane %v328_v54, 2  ;;  %vm337_vm6 = vcmp.lt.s32.totalorder %v335_v50, %v336_v52 }
  0x70   : > { %v294_v57 = vsel %vm293_vm5, %v291_v49, %v292_v51  ;;  %v338_v58 = vsel %vm337_vm6, %v335_v50, %v336_v52 }
  0x71   : > { %vm286_vm7 = vcmp.lt.s32.totalorder %v284_v53, %v285_v55  ;;  %v295_v59 = vrot.slane %v294_v57, 2  ;;  %vm330_vm8 = vcmp.lt.s32.totalorder %v328_v54, %v329_v56  ;;  %v339_v60 = vrot.slane %v338_v58, 2 }
  0x72   : > { %v287_v61 = vsel %vm286_vm7, %v284_v53, %v285_v55  ;;  %v331_v62 = vsel %vm330_vm8, %v328_v54, %v329_v56 }
  0x73   : > { %v288_v63 = vrot.slane %v287_v61, 1  ;;  %vm296_vm9 = vcmp.lt.s32.totalorder %v294_v57, %v295_v59  ;;  %v332_v0 = vrot.slane %v331_v62, 1  ;;  %vm340_vm10 = vcmp.lt.s32.totalorder %v338_v58, %v339_v60 }
  0x74   : > { %v297_v1 = vsel %vm296_vm9, %v294_v57, %v295_v59  ;;  %v341_v2 = vsel %vm340_vm10, %v338_v58, %v339_v60 }
  0x75   : > { %vm289_vm11 = vcmp.lt.s32.totalorder %v287_v61, %v288_v63  ;;  %v298_v3 = vrot.slane %v297_v1, 1  ;;  %vm333_vm12 = vcmp.lt.s32.totalorder %v331_v62, %v332_v0  ;;  %v342_v4 = vrot.slane %v341_v2, 1 }
  0x76   : > { %v290_v5 = vsel %vm289_vm11, %v287_v61, %v288_v63  ;;  %v334_v6 = vsel %vm333_vm12, %v331_v62, %v332_v0 }
  0x77   : > { %vm299_vm13 = vcmp.lt.s32.totalorder %v297_v1, %v298_v3  ;;  %vm343_vm14 = vcmp.lt.s32.totalorder %v341_v2, %v342_v4  ;;  %vm348_vm15 = vcmp.eq.s32.totalorder %v290_v5, %v959_v21  ;;  %vm354_vm0 = vcmp.eq.s32.totalorder %v334_v6, %v959_v21 }
  0x78   : > { %v300_v7 = vsel %vm299_vm13, %v297_v1, %v298_v3  ;;  %v344_v8 = vsel %vm343_vm14, %v341_v2, %v342_v4  ;;  %v532_v10 = vsel %vm348_vm15, 1.0, %v769_v9  ;;  %v534_v11 = vsel %vm354_vm0, 1.0, %v769_v9 }
  0x79   : > { %vm349_vm1 = vcmp.eq.s32.totalorder %v300_v7, %v959_v21  ;;  %vm355_vm2 = vcmp.eq.s32.totalorder %v344_v8, %v959_v21  ;;  %v360_v12 = vmul.f32 %v534_v11, %v532_v10 }
  0x7a   : > { %v533_v13 = vsel %vm349_vm1, 1.0, %v769_v9  ;;  %v535_v14 = vsel %vm355_vm2, 1.0, %v769_v9 }
  0x7b   : > { %v361_v15 = vmul.f32 %v535_v14, %v533_v13  ;;  %v369_v16 = vcombine.low %v532_v10, %v533_v13  ;;  %v374_v17 = vcombine.low %v534_v11, %v535_v14 }
  0x7d   : > { %v364_v18 = vcombine.low %v360_v12, %v361_v15  ;;  %536 = vst [vmem:[%s232_s19 + $0x8] sm:$0xff] %v369_v16  ;;  %537 = vst [vmem:[%s232_s19 + $0x10] sm:$0xff] %v374_v17 }
  0x7f   : > { %383 = vst [vmem:[%s232_s19] sm:$0xff] %v364_v18 }
  0x80   : > { %691 = shalt.err (!%p688_p2)
}
  0x81   : > { %s692_s8 = scalar_lea.hbm %s976_s28, 384  ;;  %s696_s6 = scalar_lea.hbm %s1029_s2, 768 }
  0x82   : > { %p693_p9 = scmp.ne.s32.totalorder %s976_s28, %s692_s8  ;;  %p697_p6 = scmp.lt.u32.totalorder %s976_s28, %s1029_s2 }
  0x83   : > { %p698_p13 = scmp.lt.u32.totalorder %s696_s6, %s692_s8  ;;  %p700_p8 = scmp.lt.u32.totalorder %s692_s8, %s976_s28 }
  0x84   : > { %p694_p11 = pnand %p693_p9, %p1042_p0 }
  0x85   : > { %p699_p5 = por %p698_p13, %p697_p6 }
  0x86   : > { %p695_p3 = pneg %p694_p11 }
  0x87   : > { %p701_p7 = por %p700_p8, %p699_p5 }
  0x89   : > { %p702_p4 = pnand %p701_p7, %p695_p3 }
  0x8b   : > { %705 = shalt.err (!%p702_p4)
}
  0x8c   : > { %s771_s21 = smov 128   ;;  %s772_s7 = smov 8  }
  0x8d   : > { %549 = dma.vmem_to_hbm [thread:$0]  (%p1042_p0), %s978_s30, 384, %s976_s28, %s389_s12, %s771_s21, %s771_s21, %s772_s7  }
  0x8e PF: > { %s418_s19 = sand.u32 1, %s744_s9   ;;  %p1043_p10 = scmp.ne.s32.totalorder %s1035_s24, 0 }
  0x8f   : > { %p1044_p12 = scmp.ge.s32.totalorder %s764_s14, 2  ;;  %s419_s20 = scalar_lea.sflag [#allocation7], %s418_s19 }
  0x91   : > { %p559_p1 = pnand %p1044_p12, %p1043_p10 }
  0x93   : > { %739 = dma.done.wait (!%p559_p1), %s419_s20, 384  }
  0x94   : > { %741 = vsyncadd (!%p559_p1), %s419_s20, 4294966912  ;;  %s21_s14 = sadd.s32 1, %s764_s14   ;;  %s1045_s9 = smov %s748_s10 }
  0x95   : > { %p18_p2 = scmp.ge.s32.totalorder %s21_s14, 4   ;;  %s1046_s10 = smov %s752_s11 }
  0x96   : > { %s1047_s11 = smov %s844_s23  ;;  %s1048_s12 = smov %s760_s13 }
  0x97   : > { %s1049_s13 = smov %s1051_s17  ;;  %20 = sbr.rel (!%p18_p2) target bundleno = 8 (0x8), region = 96 }
  0x9e   :  { %424 = vsyncpa [#allocation6], 1 }
  0x9f   :  { %426 = vsyncpa [#allocation6 + $0x1], 1 }
  0xa0   :  { %427 = vsyncpa [#allocation9], 1 }
  0xa1   :  { %429 = vsyncpa [#allocation9 + $0x1], 1 }
  0xa2   :  { %430 = vsyncpa [#allocation7], 1 }
  0xa3   :  { %432 = vsyncpa [#allocation7 + $0x1], 1 }

</bundles_post_ra>
